<compile_context>
chip_gen: v6e
topology: v6e:2x2x1
jax: 0.10.0
libtpu: 0.0.40
codegen_flags: <defaults>
</compile_context>

<pallas_src>
import functools

import jax
import jax.numpy as jnp
from jax.experimental import pallas as pl
from jax.experimental.pallas import tpu as pltpu


def _star_convex_kernel(tgt_ref, pred_ref, noise_ref,
                        sc_out_ref, wstar_out_ref,
                        logp_sc, oh_sc, wstar_sc, acc_sc,
                        *, lam, mu, agg_max, n_valid, blocks_per_core,
                        needs_mask):
    c = pl.program_id(0)           # core chunk (parallel axis)
    s = pl.program_id(1)           # block within the chunk (arbitrary axis)
    n_inner = pl.num_programs(1)
    tile_s, C, B = noise_ref.shape
    inv_b = 1.0 / float(B)

    @pl.when(s == 0)
    def _init():
        pred = pred_ref[...].astype(jnp.float32)                # (C, B)
        # log_softmax over the class (sublane) axis.
        m = jnp.max(pred, axis=0, keepdims=True)                # (1, B)
        z = pred - m
        lse = jnp.log(jnp.sum(jnp.exp(z), axis=0, keepdims=True))
        logp_sc[...] = z - lse                                  # (C, B)

        # One-hot built in-kernel (no B*C f32 HBM input).
        class_ids = jax.lax.broadcasted_iota(jnp.int32, (C, B), 0)
        oh = (class_ids == tgt_ref[...]).astype(jnp.float32)    # (C, B)
        oh_sc[...] = oh

        # wstar = CrossEntropyLoss(pred, targets), mean over batch.
        ws = -jnp.sum(oh * logp_sc[...], axis=0, keepdims=True)  # (1, B)
        wstar_sc[...] = jnp.sum(ws, axis=1, keepdims=True) * inv_b

        acc_sc[...] = jnp.zeros_like(acc_sc)

    logp_b = logp_sc[...][None, :, :]                           # (1, C, B)
    oh_b = oh_sc[...][None, :, :]                               # (1, C, B)
    wstar = wstar_sc[...]                                       # (1, 1)
    noise = noise_ref[...].astype(jnp.float32)                  # (T, C, B)

    # Global sample indices covered by this tile.
    sample_idx = (c * blocks_per_core + s) * tile_s + jax.lax.broadcasted_iota(
        jnp.int32, (tile_s, 1), 0)                              # (T, 1)
    if needs_mask:
        row_valid = sample_idx < n_valid                        # (T, 1)
        # Zero invalid rows so exp() of garbage (ragged last block) or of
        # re-read data (clamped duplicate blocks) stays finite.
        noise = jnp.where(row_valid[:, :, None], noise, 0.0)

    def soft_ce(x):
        # Mean-over-batch CE of softmax(x) targets against log_p, without
        # materializing the normalized softmax.  The usual per-row max cancels
        # exactly between num and den and is omitted (|x| << 80 for N(0,1)
        # noise + one-hot, so f32 exp cannot overflow).
        e = jnp.exp(x)                                          # (T, C, B)
        num = jnp.sum(e * logp_b, axis=1)                       # (T, B)
        den = jnp.sum(e, axis=1)                                # (T, B)
        per_row = -num * pl.reciprocal(den, approx=True)        # (T, B)
        return jnp.sum(per_row, axis=1, keepdims=True) * inv_b  # (T, 1)

    w = soft_ce(noise + oh_b)                                   # (T, 1)
    wtilde = soft_ce(lam * noise + oh_b)                        # (T, 1)
    n2 = jnp.sum(jnp.sum(noise * noise, axis=1), axis=1,
                 keepdims=True)                                 # (T, 1)

    sc1 = jnp.maximum(wstar - w + 0.5 * mu * n2, 0.0)
    sc2 = jnp.maximum(wtilde - (1.0 - lam) * wstar - lam * w
                      + 0.5 * mu * lam * (1.0 - lam) * n2, 0.0)
    terms = sc1 + sc2                                           # (T, 1), >= 0
    if needs_mask:
        terms = jnp.where(row_valid, terms, 0.0)                # 0 is neutral

    if agg_max:
        acc_sc[...] = jnp.maximum(acc_sc[...],
                                  jnp.max(terms, axis=0, keepdims=True))
    else:
        acc_sc[...] = acc_sc[...] + jnp.sum(terms, axis=0, keepdims=True)

    @pl.when(s == n_inner - 1)
    def _finalize():
        sc_out_ref[...] = acc_sc[...]
        wstar_out_ref[...] = wstar_sc[...]


def _vmem_budget():
    """(per-buffer noise tile bytes, scoped vmem_limit_bytes) per generation."""
    cap = None
    try:
        cap = getattr(pltpu.get_tpu_info(), "vmem_capacity_bytes", None)
    except Exception:
        cap = None
    if cap is not None and int(cap) >= 96 * 1024 * 1024:
        # v5e / v6e: 128 MiB physical VMEM — big tiles amortize per-step cost.
        return 8 * 1024 * 1024, 96 * 1024 * 1024
    # v7x (64 MiB per TensorCore) or unknown: stay conservative.  Budget
    # leaves ~3-4x the f32 slab for elementwise temporaries on top of the
    # double-buffered input tile.
    return 4 * 1024 * 1024, 48 * 1024 * 1024


def _detect_num_cores():
    n = 0
    try:
        info = pltpu.get_tpu_info()
        for attr in ("num_cores", "core_count", "tensorcore_count"):
            v = getattr(info, attr, None)
            if v:
                n = int(v)
                break
    except Exception:
        n = 0
    if n <= 0:
        try:
            n = int(getattr(jax.local_devices()[0], "num_cores", 1) or 1)
        except Exception:
            n = 1
    return max(1, min(n, 2))


def _select_tile_s(S, C, B, itemsize, per_buffer_budget):
    bytes_per_sample = max(1, C * B * itemsize)
    max_tile = max(1, min(S, per_buffer_budget // bytes_per_sample))
    # Prefer the largest divisor of S <= max_tile: no ragged last block at all.
    div = None
    for t in range(max_tile, 0, -1):
        if S % t == 0:
            div = t
            break
    if div is not None and 2 * div >= max_tile:
        return div
    # Ragged last block (masked in-kernel); keep the leading dim a multiple of
    # 8 so the (tile_s, 1) terms/mask/accumulate path stays vreg-aligned.
    if max_tile >= 8:
        return (max_tile // 8) * 8
    return max_tile


def star_convex_loss(predictions, targets, noise_scb, *, lam, mu, rho,
                     aggregation="sum", tile_s=None, num_cores=None):
    """starConvexLoss forward.

    predictions: (B, C) float logits.
    targets:     (B,) int labels.
    noise_scb:   (n_samples, C, B) pre-drawn Gaussian noise, class-major /
                 batch-on-lanes layout, ideally bf16.  The producer should
                 emit it in this layout/dtype; the wrapper does NOT relayout
                 or cast it (that would add full HBM passes over the dominant
                 stream).
    """
    B, C = predictions.shape
    S = noise_scb.shape[0]
    if noise_scb.shape != (S, C, B):
        raise ValueError(f"noise must be (n_samples, C, B)=({S},{C},{B}), "
                         f"got {noise_scb.shape}")
    agg_max = (aggregation == "max")

    # Tiny (C,B)/(1,B) side inputs; relayout cost is negligible vs the noise.
    pred_t = predictions.astype(jnp.float32).T                  # (C, B)
    tgt2d = targets.astype(jnp.int32).reshape(1, B)

    per_buffer_budget, vmem_limit = _vmem_budget()
    if tile_s is None:
        tile_s = _select_tile_s(S, C, B, jnp.dtype(noise_scb.dtype).itemsize,
                                per_buffer_budget)
    tile_s = int(max(1, min(int(tile_s), S)))
    n_blocks = -(-S // tile_s)

    if num_cores is None:
        num_cores = _detect_num_cores()
    num_cores = int(max(1, min(int(num_cores), n_blocks)))
    bpc = -(-n_blocks // num_cores)                             # blocks / core
    needs_mask = (n_blocks * tile_s != S) or (num_cores * bpc != n_blocks)
    last_block = n_blocks - 1

    def noise_index_map(c, s):
        # Clamp so duplicate trailing (c, s) slots re-read the last real block
        # (their rows are masked out in-kernel) instead of going OOB.
        return (jnp.minimum(c * bpc + s, last_block), 0, 0)

    kernel = functools.partial(
        _star_convex_kernel,
        lam=float(lam), mu=float(mu),
        agg_max=agg_max, n_valid=S,
        blocks_per_core=bpc, needs_mask=needs_mask)

    sc_parts, wstar_parts = pl.pallas_call(
        kernel,
        out_shape=(jax.ShapeDtypeStruct((num_cores, 1), jnp.float32),
                   jax.ShapeDtypeStruct((num_cores, 1), jnp.float32)),
        grid_spec=pltpu.PrefetchScalarGridSpec(
            num_scalar_prefetch=0,
            grid=(num_cores, bpc),
            in_specs=[
                pl.BlockSpec((1, B), lambda c, s: (0, 0)),          # targets
                pl.BlockSpec((C, B), lambda c, s: (0, 0)),          # logits^T
                pl.BlockSpec((tile_s, C, B), noise_index_map),      # noise tile
            ],
            out_specs=[
                pl.BlockSpec((1, 1), lambda c, s: (c, 0)),   # per-core sc
                pl.BlockSpec((1, 1), lambda c, s: (c, 0)),   # per-core wstar
            ],
            scratch_shapes=[
                pltpu.VMEM((C, B), jnp.float32),   # log_softmax(pred)
                pltpu.VMEM((C, B), jnp.float32),   # one-hot targets
                pltpu.VMEM((1, 1), jnp.float32),   # wstar
                pltpu.VMEM((1, 1), jnp.float32),   # sc accumulator
            ]),
        compiler_params=pltpu.CompilerParams(
            dimension_semantics=("parallel", "arbitrary"),
            vmem_limit_bytes=vmem_limit),
    )(tgt2d, pred_t, noise_scb)

    wstar = wstar_parts[0, 0]
    # Per-core partials are >= 0 and 0 is neutral for both reductions.
    sc = jnp.max(sc_parts) if agg_max else jnp.sum(sc_parts)
    return wstar + rho * sc


def _reference_loss(predictions, targets, noise, *, lam, mu, rho,
                    aggregation="sum"):
    """Pure-JAX reference mirroring the PyTorch module. noise: (S, B, C) f32."""
    B, C = predictions.shape
    one_hot = jax.nn.one_hot(targets, C, dtype=jnp.float32)
    log_p = jax.nn.log_softmax(predictions.astype(jnp.float32), axis=1)
    wstar = jnp.mean(-jnp.sum(one_hot * log_p, axis=1))
    sc = None
    for s in range(noise.shape[0]):
        n = noise[s]
        t_lam = jax.nn.softmax(lam * n + one_hot, axis=1)
        t_n = jax.nn.softmax(n + one_hot, axis=1)
        w = jnp.mean(-jnp.sum(t_n * log_p, axis=1))
        wtilde = jnp.mean(-jnp.sum(t_lam * log_p, axis=1))
        n2 = jnp.sum(n ** 2)
        sc1 = jnp.maximum(wstar - w + mu * n2 / 2, 0.0)
        sc2 = jnp.maximum(
            wtilde - (1 - lam) * wstar - lam * w
            + mu * lam * (1 - lam) * n2 / 2, 0.0)
        term = sc1 + sc2
        if sc is None:
            sc = term
        elif aggregation == "max":
            sc = jnp.maximum(sc, term)
        else:
            sc = sc + term
    return wstar + rho * sc


if __name__ == "__main__":
    # Hyperparameters of the module (synthetic, deterministic).
    lam, mu, rho = 0.5, 0.1, 0.01

    # Small shapes: batch=8, classes=10 (one_hot_target hard-codes 10 classes).
    # Production shapes should use B as a multiple of 128 (lane axis).
    B, C = 8, 10
    key = jax.random.PRNGKey(0)
    k_pred, k_tgt, k1, k2, k3 = jax.random.split(key, 5)
    predictions = jax.random.normal(k_pred, (B, C), dtype=jnp.float32)
    targets = jax.random.randint(k_tgt, (B,), 0, C, dtype=jnp.int32)

    def run_case(k, n_samples, aggregation, **kw):
        # Producer emits noise directly in (S, C, B) bf16 — the layout/dtype
        # the kernel streams; no wrapper-side transpose/cast/pad copies.
        noise_scb = jax.random.normal(k, (n_samples, C, B), dtype=jnp.bfloat16)
        loss = star_convex_loss(predictions, targets, noise_scb,
                                lam=lam, mu=mu, rho=rho,
                                aggregation=aggregation, **kw)
        loss = jax.block_until_ready(loss)
        noise_sbc = jnp.transpose(noise_scb.astype(jnp.float32), (0, 2, 1))
        ref = _reference_loss(predictions, targets, noise_sbc,
                              lam=lam, mu=mu, rho=rho, aggregation=aggregation)
        assert jnp.allclose(loss, ref, rtol=1e-3, atol=1e-3), (
            aggregation, loss, ref)

    # Case 1: 'sum', auto tile / auto cores (single block fast path).
    run_case(k1, 4, "sum")

    # Case 2: 'max', forced small tile -> multi-block grid with a ragged last
    # block handled by the in-kernel mask (no jnp.pad).
    run_case(k2, 6, "max", tile_s=4)

    # Case 3/4: forced 2-core split (correct even on single-core parts) with a
    # ragged last block AND a clamped duplicate block slot, both aggregations.
    run_case(k3, 5, "sum", tile_s=2, num_cores=2)
    run_case(k3, 5, "max", tile_s=2, num_cores=2)

    print("KERNEL_OK")
</pallas_src>

<mosaic_0001>
module attributes {stable_mosaic.version = 11 : i64} {
  func.func @_star_convex_kernel(%arg0: i32, %arg1: i32, %arg2: memref<1x8xi32, #tpu.memory_space<vmem>>, %arg3: memref<10x8xf32, #tpu.memory_space<vmem>>, %arg4: memref<4x10x8xbf16, #tpu.memory_space<vmem>>, %arg5: memref<1x1xf32, #tpu.memory_space<vmem>>, %arg6: memref<1x1xf32, #tpu.memory_space<vmem>>, %arg7: memref<10x8xf32, #tpu.memory_space<vmem>>, %arg8: memref<10x8xf32, #tpu.memory_space<vmem>>, %arg9: memref<1x1xf32, #tpu.memory_space<vmem>>, %arg10: memref<1x1xf32, #tpu.memory_space<vmem>>) attributes {dimension_semantics = [#tpu.dimension_semantics<parallel>, #tpu.dimension_semantics<arbitrary>], iteration_bounds = array<i64: 1, 1>, scalar_prefetch = 0 : i64, scratch_operands = 4 : i64, tpu.core_type = #tpu.core_type<tc>, window_params = [{pipeline_mode = #tpu.pipeline_mode<synchronous>, transform_indices = @transform_0, window_bounds = array<i64: 1, 8>}, {pipeline_mode = #tpu.pipeline_mode<synchronous>, transform_indices = @transform_1, window_bounds = array<i64: 10, 8>}, {transform_indices = @transform_2, window_bounds = array<i64: 4, 10, 8>}, {transform_indices = @transform_3, window_bounds = array<i64: 1, 1>}, {transform_indices = @transform_4, window_bounds = array<i64: 1, 1>}]} {
    %c0_i32 = arith.constant 0 : i32
    %0 = arith.cmpi eq, %arg1, %c0_i32 : i32
    %1 = arith.extui %0 : i1 to i32
    %c0_i32_0 = arith.constant 0 : i32
    %2 = arith.cmpi ne, %1, %c0_i32_0 : i32
    scf.if %2 {
      %c0_34 = arith.constant 0 : index
      %c0_35 = arith.constant 0 : index
      %74 = vector.load %arg3[%c0_34, %c0_35] : memref<10x8xf32, #tpu.memory_space<vmem>>, vector<10x8xf32>
      %cst_36 = arith.constant dense<0xFF800000> : vector<8xf32>
      %75 = vector.multi_reduction <maximumf>, %74, %cst_36 [0] : vector<10x8xf32> to vector<8xf32>
      %76 = vector.shape_cast %75 : vector<8xf32> to vector<1x8xf32>
      %77 = vector.broadcast %76 : vector<1x8xf32> to vector<10x8xf32>
      %78 = arith.subf %74, %77 : vector<10x8xf32>
      %79 = math.exp %78 : vector<10x8xf32>
      %cst_37 = arith.constant dense<0.000000e+00> : vector<8xf32>
      %80 = vector.multi_reduction <add>, %79, %cst_37 [0] : vector<10x8xf32> to vector<8xf32>
      %81 = vector.shape_cast %80 : vector<8xf32> to vector<1x8xf32>
      %82 = math.log %81 : vector<1x8xf32>
      %83 = vector.broadcast %82 : vector<1x8xf32> to vector<10x8xf32>
      %84 = arith.subf %78, %83 : vector<10x8xf32>
      %c0_38 = arith.constant 0 : index
      %c0_39 = arith.constant 0 : index
      %85 = vector.load %arg7[%c0_38, %c0_39] : memref<10x8xf32, #tpu.memory_space<vmem>>, vector<10x8xf32>
      tpu.vector_store %arg7[%c0_38, %c0_39], %84 {strides = array<i32>} : memref<10x8xf32, #tpu.memory_space<vmem>>, vector<10x8xf32>,
      %86 = tpu.iota {dimensions = array<i32: 0>} : vector<10x8xi32>
      %c0_40 = arith.constant 0 : index
      %c0_41 = arith.constant 0 : index
      %87 = vector.load %arg2[%c0_40, %c0_41] : memref<1x8xi32, #tpu.memory_space<vmem>>, vector<1x8xi32>
      %88 = vector.broadcast %87 : vector<1x8xi32> to vector<10x8xi32>
      %89 = arith.cmpi eq, %86, %88 : vector<10x8xi32>
      %90 = arith.extui %89 : vector<10x8xi1> to vector<10x8xi32>
      %91 = arith.sitofp %90 : vector<10x8xi32> to vector<10x8xf32>
      %c0_42 = arith.constant 0 : index
      %c0_43 = arith.constant 0 : index
      %92 = vector.load %arg8[%c0_42, %c0_43] : memref<10x8xf32, #tpu.memory_space<vmem>>, vector<10x8xf32>
      tpu.vector_store %arg8[%c0_42, %c0_43], %91 {strides = array<i32>} : memref<10x8xf32, #tpu.memory_space<vmem>>, vector<10x8xf32>,
      %c0_44 = arith.constant 0 : index
      %c0_45 = arith.constant 0 : index
      %93 = vector.load %arg7[%c0_44, %c0_45] : memref<10x8xf32, #tpu.memory_space<vmem>>, vector<10x8xf32>
      %94 = arith.mulf %91, %93 : vector<10x8xf32>
      %cst_46 = arith.constant dense<0.000000e+00> : vector<8xf32>
      %95 = vector.multi_reduction <add>, %94, %cst_46 [0] : vector<10x8xf32> to vector<8xf32>
      %96 = vector.shape_cast %95 : vector<8xf32> to vector<1x8xf32>
      %cst_47 = arith.constant 0.000000e+00 : f32
      %97 = vector.broadcast %cst_47 : f32 to vector<1x8xf32>
      %98 = arith.subf %97, %96 : vector<1x8xf32>
      %cst_48 = arith.constant dense<0.000000e+00> : vector<1xf32>
      %99 = vector.multi_reduction <add>, %98, %cst_48 [1] : vector<1x8xf32> to vector<1xf32>
      %100 = vector.shape_cast %99 : vector<1xf32> to vector<1x1xf32>
      %cst_49 = arith.constant 1.250000e-01 : f32
      %101 = vector.broadcast %cst_49 : f32 to vector<1x1xf32>
      %102 = arith.mulf %100, %101 : vector<1x1xf32>
      %c0_50 = arith.constant 0 : index
      %c0_51 = arith.constant 0 : index
      %103 = vector.load %arg9[%c0_50, %c0_51] : memref<1x1xf32, #tpu.memory_space<vmem>>, vector<1x1xf32>
      tpu.vector_store %arg9[%c0_50, %c0_51], %102 {strides = array<i32>} : memref<1x1xf32, #tpu.memory_space<vmem>>, vector<1x1xf32>,
      %cst_52 = arith.constant 0.000000e+00 : f32
      %104 = vector.broadcast %cst_52 : f32 to vector<1x1xf32>
      %c0_53 = arith.constant 0 : index
      %c0_54 = arith.constant 0 : index
      %105 = vector.load %arg10[%c0_53, %c0_54] : memref<1x1xf32, #tpu.memory_space<vmem>>, vector<1x1xf32>
      tpu.vector_store %arg10[%c0_53, %c0_54], %104 {strides = array<i32>} : memref<1x1xf32, #tpu.memory_space<vmem>>, vector<1x1xf32>,
    } else {
    }
    %c0 = arith.constant 0 : index
    %c0_1 = arith.constant 0 : index
    %3 = vector.load %arg7[%c0, %c0_1] : memref<10x8xf32, #tpu.memory_space<vmem>>, vector<10x8xf32>
    %4 = vector.shape_cast %3 : vector<10x8xf32> to vector<1x10x8xf32>
    %c0_2 = arith.constant 0 : index
    %c0_3 = arith.constant 0 : index
    %5 = vector.load %arg8[%c0_2, %c0_3] : memref<10x8xf32, #tpu.memory_space<vmem>>, vector<10x8xf32>
    %6 = vector.shape_cast %5 : vector<10x8xf32> to vector<1x10x8xf32>
    %c0_4 = arith.constant 0 : index
    %c0_5 = arith.constant 0 : index
    %7 = vector.load %arg9[%c0_4, %c0_5] : memref<1x1xf32, #tpu.memory_space<vmem>>, vector<1x1xf32>
    %c0_6 = arith.constant 0 : index
    %c0_7 = arith.constant 0 : index
    %c0_8 = arith.constant 0 : index
    %8 = vector.load %arg4[%c0_6, %c0_7, %c0_8] : memref<4x10x8xbf16, #tpu.memory_space<vmem>>, vector<4x10x8xbf16>
    %9 = arith.extf %8 : vector<4x10x8xbf16> to vector<4x10x8xf32>
    %10 = vector.broadcast %6 : vector<1x10x8xf32> to vector<4x10x8xf32>
    %11 = arith.addf %9, %10 : vector<4x10x8xf32>
    %12 = math.exp %11 : vector<4x10x8xf32>
    %13 = vector.broadcast %4 : vector<1x10x8xf32> to vector<4x10x8xf32>
    %14 = arith.mulf %12, %13 : vector<4x10x8xf32>
    %cst = arith.constant dense<0.000000e+00> : vector<4x8xf32>
    %15 = vector.multi_reduction <add>, %14, %cst [1] : vector<4x10x8xf32> to vector<4x8xf32>
    %cst_9 = arith.constant dense<0.000000e+00> : vector<4x8xf32>
    %16 = vector.multi_reduction <add>, %12, %cst_9 [1] : vector<4x10x8xf32> to vector<4x8xf32>
    %cst_10 = arith.constant 0.000000e+00 : f32
    %17 = vector.broadcast %cst_10 : f32 to vector<4x8xf32>
    %18 = arith.subf %17, %15 : vector<4x8xf32>
    %19 = tpu.reciprocal %16 {approx = true} : vector<4x8xf32> -> vector<4x8xf32>
    %20 = arith.mulf %18, %19 : vector<4x8xf32>
    %cst_11 = arith.constant dense<0.000000e+00> : vector<4xf32>
    %21 = vector.multi_reduction <add>, %20, %cst_11 [1] : vector<4x8xf32> to vector<4xf32>
    %22 = vector.shape_cast %21 : vector<4xf32> to vector<4x1xf32>
    %cst_12 = arith.constant 1.250000e-01 : f32
    %23 = vector.broadcast %cst_12 : f32 to vector<4x1xf32>
    %24 = arith.mulf %22, %23 : vector<4x1xf32>
    %cst_13 = arith.constant 5.000000e-01 : f32
    %25 = vector.broadcast %cst_13 : f32 to vector<4x10x8xf32>
    %26 = arith.mulf %25, %9 : vector<4x10x8xf32>
    %27 = vector.broadcast %6 : vector<1x10x8xf32> to vector<4x10x8xf32>
    %28 = arith.addf %26, %27 : vector<4x10x8xf32>
    %29 = math.exp %28 : vector<4x10x8xf32>
    %30 = vector.broadcast %4 : vector<1x10x8xf32> to vector<4x10x8xf32>
    %31 = arith.mulf %29, %30 : vector<4x10x8xf32>
    %cst_14 = arith.constant dense<0.000000e+00> : vector<4x8xf32>
    %32 = vector.multi_reduction <add>, %31, %cst_14 [1] : vector<4x10x8xf32> to vector<4x8xf32>
    %cst_15 = arith.constant dense<0.000000e+00> : vector<4x8xf32>
    %33 = vector.multi_reduction <add>, %29, %cst_15 [1] : vector<4x10x8xf32> to vector<4x8xf32>
    %cst_16 = arith.constant 0.000000e+00 : f32
    %34 = vector.broadcast %cst_16 : f32 to vector<4x8xf32>
    %35 = arith.subf %34, %32 : vector<4x8xf32>
    %36 = tpu.reciprocal %33 {approx = true} : vector<4x8xf32> -> vector<4x8xf32>
    %37 = arith.mulf %35, %36 : vector<4x8xf32>
    %cst_17 = arith.constant dense<0.000000e+00> : vector<4xf32>
    %38 = vector.multi_reduction <add>, %37, %cst_17 [1] : vector<4x8xf32> to vector<4xf32>
    %39 = vector.shape_cast %38 : vector<4xf32> to vector<4x1xf32>
    %cst_18 = arith.constant 1.250000e-01 : f32
    %40 = vector.broadcast %cst_18 : f32 to vector<4x1xf32>
    %41 = arith.mulf %39, %40 : vector<4x1xf32>
    %42 = arith.mulf %9, %9 : vector<4x10x8xf32>
    %cst_19 = arith.constant dense<0.000000e+00> : vector<4x8xf32>
    %43 = vector.multi_reduction <add>, %42, %cst_19 [1] : vector<4x10x8xf32> to vector<4x8xf32>
    %cst_20 = arith.constant dense<0.000000e+00> : vector<4xf32>
    %44 = vector.multi_reduction <add>, %43, %cst_20 [1] : vector<4x8xf32> to vector<4xf32>
    %45 = vector.shape_cast %44 : vector<4xf32> to vector<4x1xf32>
    %46 = vector.broadcast %7 : vector<1x1xf32> to vector<4x1xf32>
    %47 = arith.subf %46, %24 : vector<4x1xf32>
    %cst_21 = arith.constant 5.000000e-02 : f32
    %48 = vector.broadcast %cst_21 : f32 to vector<4x1xf32>
    %49 = arith.mulf %48, %45 : vector<4x1xf32>
    %50 = arith.addf %47, %49 : vector<4x1xf32>
    %cst_22 = arith.constant 0.000000e+00 : f32
    %51 = vector.broadcast %cst_22 : f32 to vector<4x1xf32>
    %52 = arith.maximumf %50, %51 : vector<4x1xf32>
    %cst_23 = arith.constant 5.000000e-01 : f32
    %53 = vector.broadcast %cst_23 : f32 to vector<1x1xf32>
    %54 = arith.mulf %53, %7 : vector<1x1xf32>
    %55 = vector.broadcast %54 : vector<1x1xf32> to vector<4x1xf32>
    %56 = arith.subf %41, %55 : vector<4x1xf32>
    %cst_24 = arith.constant 5.000000e-01 : f32
    %57 = vector.broadcast %cst_24 : f32 to vector<4x1xf32>
    %58 = arith.mulf %57, %24 : vector<4x1xf32>
    %59 = arith.subf %56, %58 : vector<4x1xf32>
    %cst_25 = arith.constant 1.250000e-02 : f32
    %60 = vector.broadcast %cst_25 : f32 to vector<4x1xf32>
    %61 = arith.mulf %60, %45 : vector<4x1xf32>
    %62 = arith.addf %59, %61 : vector<4x1xf32>
    %cst_26 = arith.constant 0.000000e+00 : f32
    %63 = vector.broadcast %cst_26 : f32 to vector<4x1xf32>
    %64 = arith.maximumf %62, %63 : vector<4x1xf32>
    %65 = arith.addf %52, %64 : vector<4x1xf32>
    %c0_27 = arith.constant 0 : index
    %c0_28 = arith.constant 0 : index
    %66 = vector.load %arg10[%c0_27, %c0_28] : memref<1x1xf32, #tpu.memory_space<vmem>>, vector<1x1xf32>
    %cst_29 = arith.constant dense<0.000000e+00> : vector<1xf32>
    %67 = vector.multi_reduction <add>, %65, %cst_29 [0] : vector<4x1xf32> to vector<1xf32>
    %68 = vector.shape_cast %67 : vector<1xf32> to vector<1x1xf32>
    %69 = arith.addf %66, %68 : vector<1x1xf32>
    %c0_30 = arith.constant 0 : index
    %c0_31 = arith.constant 0 : index
    %70 = vector.load %arg10[%c0_30, %c0_31] : memref<1x1xf32, #tpu.memory_space<vmem>>, vector<1x1xf32>
    tpu.vector_store %arg10[%c0_30, %c0_31], %69 {strides = array<i32>} : memref<1x1xf32, #tpu.memory_space<vmem>>, vector<1x1xf32>,
    %c0_i32_32 = arith.constant 0 : i32
    %71 = arith.cmpi eq, %arg1, %c0_i32_32 : i32
    %72 = arith.extui %71 : i1 to i32
    %c0_i32_33 = arith.constant 0 : i32
    %73 = arith.cmpi ne, %72, %c0_i32_33 : i32
    scf.if %73 {
      %c0_34 = arith.constant 0 : index
      %c0_35 = arith.constant 0 : index
      %74 = vector.load %arg10[%c0_34, %c0_35] : memref<1x1xf32, #tpu.memory_space<vmem>>, vector<1x1xf32>
      %c0_36 = arith.constant 0 : index
      %c0_37 = arith.constant 0 : index
      %75 = vector.load %arg5[%c0_36, %c0_37] : memref<1x1xf32, #tpu.memory_space<vmem>>, vector<1x1xf32>
      tpu.vector_store %arg5[%c0_36, %c0_37], %74 {strides = array<i32>} : memref<1x1xf32, #tpu.memory_space<vmem>>, vector<1x1xf32>,
      %c0_38 = arith.constant 0 : index
      %c0_39 = arith.constant 0 : index
      %76 = vector.load %arg9[%c0_38, %c0_39] : memref<1x1xf32, #tpu.memory_space<vmem>>, vector<1x1xf32>
      %c0_40 = arith.constant 0 : index
      %c0_41 = arith.constant 0 : index
      %77 = vector.load %arg6[%c0_40, %c0_41] : memref<1x1xf32, #tpu.memory_space<vmem>>, vector<1x1xf32>
      tpu.vector_store %arg6[%c0_40, %c0_41], %76 {strides = array<i32>} : memref<1x1xf32, #tpu.memory_space<vmem>>, vector<1x1xf32>,
    } else {
    }
    return
  }
  func.func @transform_0(%arg0: i32, %arg1: i32) -> (i32, i32) {
    %c0_i32 = arith.constant 0 : i32
    %c0_i32_0 = arith.constant 0 : i32
    %c0_i32_1 = arith.constant 0 : i32
    return %c0_i32, %c0_i32_0 : i32, i32
  }
  func.func @transform_1(%arg0: i32, %arg1: i32) -> (i32, i32) {
    %c0_i32 = arith.constant 0 : i32
    %c0_i32_0 = arith.constant 0 : i32
    %c0_i32_1 = arith.constant 0 : i32
    return %c0_i32, %c0_i32_0 : i32, i32
  }
  func.func @transform_2(%arg0: i32, %arg1: i32) -> (i32, i32, i32) {
    %c1_i32 = arith.constant 1 : i32
    %0 = arith.muli %arg0, %c1_i32 : i32
    %1 = arith.addi %0, %arg1 : i32
    %c0_i32 = arith.constant 0 : i32
    %2 = arith.minsi %1, %c0_i32 : i32
    %c0_i32_0 = arith.constant 0 : i32
    %c0_i32_1 = arith.constant 0 : i32
    %c0_i32_2 = arith.constant 0 : i32
    return %2, %c0_i32_0, %c0_i32_1 : i32, i32, i32
  }
  func.func @transform_3(%arg0: i32, %arg1: i32) -> (i32, i32) {
    %c0_i32 = arith.constant 0 : i32
    %c0_i32_0 = arith.constant 0 : i32
    return %arg0, %c0_i32 : i32, i32
  }
  func.func @transform_4(%arg0: i32, %arg1: i32) -> (i32, i32) {
    %c0_i32 = arith.constant 0 : i32
    %c0_i32_0 = arith.constant 0 : i32
    return %arg0, %c0_i32 : i32, i32
  }
}

</mosaic_0001>

<bundles_post_ra>
// kernel: tpu_custom_call.1
= control target key start
LH: loop header
LB: loop body
LE: loop exit
PB: predicated region body
PF: predicated region fallthrough
CT: control target
= control target key end

     0   :  { %10 = vsyncpa [#allocation7], 0  ;;  %vm59_vm0 = vcmask 64512   ;;  %vm61_vm1 = vcmask 58368   ;;  %v91_v2 = vlaneseq  ;;  %s947_s0 = inlined_call_operand.vmem [shape: s32[1,8], index: 0, kind: input, shape index: {}]   ;;  %s948_s1 = inlined_call_operand.vmem [shape: f32[10,8], index: 1, kind: input, shape index: {}]   ;;  %s949_s2 = inlined_call_operand.vmem [shape: bf16[4,10,8], index: 2, kind: input, shape index: {}]   ;;  %s950_s3 = inlined_call_operand.hbm [shape: f32[1,1], index: 3, kind: output, shape index: {0}]   ;;  %s951_s4 = inlined_call_operand.hbm [shape: f32[1,1], index: 4, kind: output, shape index: {1}]  }
   0x1   :  { %v57_v0 = vld [vmem:[%s948_s1] sm:$0xff]  ;;  %v58_v1 = vld [vmem:[%s948_s1 + $0x8] sm:$0x3] }
   0x2   :  { %v60_v3 = vsel %vm59_vm0, %v57_v0, -inf  ;;  %v62_v4 = vsel %vm61_vm1, %v58_v1, -inf  ;;  %v551_v5 = vld [vmem:[%s947_s0] ss:$0 sm:$0xff]  ;;  %v694_v7 = vshrl.u32 %v91_v2, 7 }
   0x3   :  { %v63_v6 = vmax.f32 %v60_v3, %v62_v4  ;;  %v133_v8 = vld [vmem:[%s949_s2] ss:$8 sps:$4 sm:$0xff]  }
   0x4   :  { %v93_v10 = vadd.s32 8, %v694_v7  ;;  %vm99_vm2 = vcmp.eq.s32.totalorder %v694_v7, %v551_v5 }
   0x5   :  { %v64_v9 = vrot.slane %v63_v6, 4 }
   0x6   :  { %11 = vsyncpa [#allocation9], 0  ;;  %v655_v11 = vmov 0.0   ;;  %v134_v13 = vld [vmem:[%s949_s2 + $0x4] sm:$0x1]  ;;  %vm100_vm3 = vcmp.eq.s32.totalorder %v93_v10, %v551_v5  ;;  %v715_v17 = vunpack.c.l.bf16 %v133_v8  ;;  %v723_v20 = vunpack.c.h.bf16 %v133_v8 }
   0x7   :  { %v702_v12 = vsel %vm99_vm2, 1.0, %v655_v11  ;;  %v136_v14 = vld [vmem:[%s949_s2 + $0xc] sm:$0x1]  ;;  %v65_v15 = vmax.f32 %v63_v6, %v64_v9  ;;  %v137_v16 = vld [vmem:[%s949_s2 + $0x10] ss:$8 sps:$4 sm:$0xff]   ;;  %v718_v18 = vsel %vm100_vm3, 1.0, %v655_v11  ;;  %v730_v23 = vunpack.c.l.bf16 %v134_v13 }
   0x8   :  { %105 = vst.msk [vmem:[#allocation3] sm:$0xff] %vm59_vm0, %v702_v12  ;;  %v138_v19 = vld [vmem:[%s949_s2 + $0x14] sm:$0x1]  ;;  %v140_v22 = vld [vmem:[%s949_s2 + $0x1c] sm:$0x1]  ;;  %v732_v24 = vunpack.c.l.bf16 %v136_v14  ;;  %v734_v25 = vunpack.c.l.bf16 %v137_v16  ;;  %v283_v28 = vmul.f32 0.5, %v715_v17  ;;  %v739_v29 = vunpack.c.h.bf16 %v137_v16 }
   0x9   :  { %v66_v21 = vrot.slane %v65_v15, 2  ;;  %106 = vst.msk [vmem:[#allocation3 + $0x8] sm:$0x3] %vm61_vm1, %v718_v18  ;;  %v736_v27 = vunpack.c.l.bf16 %v138_v19  ;;  %v741_v30 = vunpack.c.l.bf16 %v140_v22  ;;  %v285_v31 = vmul.f32 0.5, %v723_v20  ;;  %s656_s2 = smov [#allocation8]  }
   0xa   :  { %v284_v33 = vmul.f32 0.5, %v730_v23  ;;  %v286_v34 = vmul.f32 0.5, %v732_v24  ;;  %v287_v36 = vmul.f32 0.5, %v734_v25  ;;  %v289_v41 = vmul.f32 0.5, %v739_v29  ;;  %s533_s5 = sshll.u32 %s656_s2, 4  ;;  %s534_s5 = int_to_ptr.vmem [resolvable:$true] %s533_s5 }
   0xb   :  { %v67_v26 = vmax.f32 %v65_v15, %v66_v21  ;;  %v288_v38 = vmul.f32 0.5, %v736_v27  ;;  %v290_v42 = vmul.f32 0.5, %v741_v30  ;;  %vm125_vm4 = vcmask 0   ;;  %s611_s6 = scalar_lea.vmem %s534_s5, 16  ;;  %s615_s7 = scalar_lea.vmem %s534_s5, 32 }
   0xc   :  { %127 = vst.msk [vmem:[#allocation5] sm:$0x1] %vm125_vm4, %v655_v11  ;;  %vm271_vm5 = vcmask 1041409   ;;  %vm273_vm6 = vcmask 1042434   ;;  %vm275_vm7 = vcmask 1043459   ;;  %vm278_vm8 = vcmask 60416   ;;  %p612_p0 = scmp.ne.s32.totalorder %s534_s5, %s611_s6  ;;  %p616_p1 = scmp.lt.s32.totalorder %s534_s5, %s534_s5 }
   0xd   :  { %v68_v32 = vrot.slane %v67_v26, 1  ;;  %p617_p2 = scmp.lt.s32.totalorder %s615_s7, %s611_s6 }
   0xf   :  { %v130_v35 = vld [vmem:[#allocation3] sm:$0xff]  ;;  %v69_v37 = vmax.f32 %v67_v26, %v68_v32  ;;  %v420_v32 = vmul.f32 %v730_v23, %v730_v23  ;;  %p618_p3 = por %p617_p2, %p616_p1 }
  0x10   :  { %v291_v39 = vadd.f32 %v283_v28, %v130_v35  ;;  %v131_v40 = vld [vmem:[#allocation3 + $0x8] sm:$0x3]  ;;  %v293_v43 = vadd.f32 %v285_v31, %v130_v35  ;;  %v295_v48 = vadd.f32 %v287_v36, %v130_v35  ;;  %v297_v54 = vadd.f32 %v289_v41, %v130_v35 }
  0x11   :  { %v750_v44 = vsub.f32 %v57_v0, %v69_v37  ;;  %v752_v45 = vsub.f32 %v58_v1, %v69_v37  ;;  %v292_v46 = vadd.f32 %v284_v33, %v131_v40  ;;  %v294_v47 = vadd.f32 %v286_v34, %v131_v40  ;;  %p619_p4 = pnand %p618_p3, %p612_p0 }
  0x12   :  { %v299_v49 = vmul.f32 1.442695, %v291_v39  ;;  %v296_v52 = vadd.f32 %v288_v38, %v131_v40  ;;  %v303_v55 = vmul.f32 1.442695, %v293_v43  ;;  %v298_v56 = vadd.f32 %v290_v42, %v131_v40 }
  0x13   :  { %v72_v50 = vmul.f32 1.442695, %v750_v44  ;;  %v74_v51 = vmul.f32 1.442695, %v752_v45  ;;  %v301_v53 = vmul.f32 1.442695, %v292_v46  ;;  %v149_v59 = vadd.f32 %v715_v17, %v130_v35 }
  0x14   :  { %557 = vpow2.f32 %v299_v49  ;;  %v305_v57 = vmul.f32 1.442695, %v294_v47  ;;  %v307_v58 = vmul.f32 1.442695, %v295_v48  ;;  %v309_v60 = vmul.f32 1.442695, %v296_v52 }
  0x15   :  { %559 = vpow2.f32 %v72_v50  ;;  %v150_v61 = vadd.f32 %v730_v23, %v131_v40  ;;  %v311_v62 = vmul.f32 1.442695, %v297_v54  ;;  %v151_v63 = vadd.f32 %v723_v20, %v130_v35 }
  0x16   :  { %561 = vpow2.f32 %v74_v51  ;;  %v313_v0 = vmul.f32 1.442695, %v298_v56  ;;  %v152_v1 = vadd.f32 %v732_v24, %v131_v40  ;;  %v153_v2 = vadd.f32 %v734_v25, %v130_v35 }
  0x17   :  { %563 = vpow2.f32 %v301_v53  ;;  %v157_v3 = vmul.f32 1.442695, %v149_v59  ;;  %v154_v4 = vadd.f32 %v736_v27, %v131_v40  ;;  %v159_v5 = vmul.f32 1.442695, %v150_v61 }
  0x18   :  { %565 = vpow2.f32 %v303_v55  ;;  %v161_v6 = vmul.f32 1.442695, %v151_v63  ;;  %v155_v8 = vadd.f32 %v739_v29, %v130_v35  ;;  %v163_v9 = vmul.f32 1.442695, %v152_v1 }
  0x19   :  { %567 = vpow2.f32 %v305_v57  ;;  %v156_v10 = vadd.f32 %v741_v30, %v131_v40  ;;  %v165_v13 = vmul.f32 1.442695, %v153_v2  ;;  %v167_v14 = vmul.f32 1.442695, %v154_v4 }
  0x1a   :  { %569 = vpow2.f32 %v307_v58  ;;  %v169_v16 = vmul.f32 1.442695, %v155_v8  ;;  %v419_v31 = vmul.f32 %v715_v17, %v715_v17  ;;  %v421_v33 = vmul.f32 %v723_v20, %v723_v20 }
  0x1b   :  { %571 = vpow2.f32 %v309_v60  ;;  %v171_v21 = vmul.f32 1.442695, %v156_v10  ;;  %v422_v36 = vmul.f32 %v732_v24, %v732_v24  ;;  %v423_v17 = vmul.f32 %v734_v25, %v734_v25 }
  0x1c   :  { %573 = vpow2.f32 %v311_v62  ;;  %v424_v23 = vmul.f32 %v736_v27, %v736_v27  ;;  %v425_v25 = vmul.f32 %v739_v29, %v739_v29  ;;  %v427_v43 = vsel %vm59_vm0, %v419_v31, 0.0 }
  0x1d   :  { %575 = vpow2.f32 %v313_v0  ;;  %v428_v27 = vsel %vm61_vm1, %v420_v32, 0.0  ;;  %v436_v46 = vsel %vm59_vm0, %v421_v33, 0.0  ;;  %v437_v51 = vsel %vm61_vm1, %v422_v36, 0.0 }
  0x1e   :  { %577 = vpow2.f32 %v157_v3  ;;  %v426_v55 = vmul.f32 %v741_v30, %v741_v30  ;;  %v429_v59 = vadd.f32 %v428_v27, %v427_v43  ;;  %v438_v62 = vadd.f32 %v437_v51, %v436_v46 }
  0x1f   :  { %579 = vpow2.f32 %v159_v5  ;;  %v445_v63 = vsel %vm59_vm0, %v423_v17, 0.0  ;;  %v446_v0 = vsel %vm61_vm1, %v424_v23, 0.0 }
  0x20   :  { %581 = vpow2.f32 %v161_v6  ;;  %v455_v10 = vsel %vm61_vm1, %v426_v55, 0.0  ;;  %v447_v31 = vadd.f32 %v446_v0, %v445_v63  ;;  %v439_v36 = vrot.slane %v438_v62, 4 }
  0x21   :  { %v766_v15 = vpop.eup %557  ;;  %583 = vpow2.f32 %v163_v9  ;;  %v454_v9 = vsel %vm59_vm0, %v425_v25, 0.0 }
  0x22   :  { %v560_v19 = vpop.eup %559  ;;  %585 = vpow2.f32 %v165_v13  ;;  %v359_v38 = vsel %vm59_vm0, %v766_v15, 0.0 }
  0x23   :  { %v562_v22 = vpop.eup %561  ;;  %v76_v26 = vsel %vm59_vm0, %v560_v19, 0.0  ;;  %587 = vpow2.f32 %v167_v14 }
  0x24   :  { %v769_v28 = vpop.eup %563  ;;  %v77_v11 = vsel %vm61_vm1, %v562_v22, 0.0  ;;  %589 = vpow2.f32 %v169_v16 }
  0x25   :  { %v778_v34 = vpop.eup %565  ;;  %v78_v35 = vadd.f32 %v77_v11, %v76_v26  ;;  %591 = vpow2.f32 %v171_v21  ;;  %v360_v40 = vsel %vm61_vm1, %v769_v28, 0.0  ;;  %v430_v11 = vrot.slane %v429_v59, 4 }
  0x26   :  { %v782_v37 = vpop.eup %567  ;;  %v368_v24 = vsel %vm59_vm0, %v778_v34, 0.0  ;;  %v361_v29 = vadd.f32 %v360_v40, %v359_v38  ;;  %v456_v40 = vadd.f32 %v455_v10, %v454_v9 }
  0x27   :  { %v790_v20 = vpop.eup %569  ;;  %v79_v39 = vrot.slane %v78_v35, 4  ;;  %v369_v41 = vsel %vm61_vm1, %v782_v37, 0.0  ;;  %v431_v46 = vadd.f32 %v430_v11, %v429_v59 }
  0x28   :  { %v798_v42 = vpop.eup %571  ;;  %v377_v49 = vsel %vm59_vm0, %v790_v20, 0.0  ;;  %v370_v53 = vadd.f32 %v369_v41, %v368_v24  ;;  %v362_v6 = vrot.slane %v361_v29, 4 }
  0x29   :  { %v805_v47 = vpop.eup %573  ;;  %v80_v48 = vadd.f32 %v79_v39, %v78_v35  ;;  %v378_v50 = vsel %vm61_vm1, %v798_v42, 0.0 }
  0x2a   :  { %v812_v52 = vpop.eup %575  ;;  %v386_v54 = vsel %vm59_vm0, %v805_v47, 0.0  ;;  %v379_v61 = vadd.f32 %v378_v50, %v377_v49  ;;  %v371_v8 = vrot.slane %v370_v53, 4  ;;  %v363_v17 = vadd.f32 %v362_v6, %v361_v29 }
  0x2b   :  { %v818_v56 = vpop.eup %577  ;;  %v81_v57 = vrot.slane %v80_v48, 2  ;;  %v387_v58 = vsel %vm61_vm1, %v812_v52, 0.0  ;;  %v440_v29 = vadd.f32 %v439_v36, %v438_v62 }
  0x2c   :  { %v822_v60 = vpop.eup %579  ;;  %v388_v3 = vadd.f32 %v387_v58, %v386_v54  ;;  %v219_v30 = vsel %vm59_vm0, %v818_v56, 0.0  ;;  %v380_v26 = vrot.slane %v379_v61, 4  ;;  %v372_v41 = vadd.f32 %v371_v8, %v370_v53 }
  0x2d   :  { %v826_v1 = vpop.eup %581  ;;  %v82_v2 = vadd.f32 %v81_v57, %v80_v48  ;;  %v220_v4 = vsel %vm61_vm1, %v822_v60, 0.0  ;;  %v448_v48 = vrot.slane %v447_v31, 4  ;;  %v364_v54 = vrot.slane %v363_v17, 2 }
  0x2e   :  { %v832_v5 = vpop.eup %583  ;;  %v221_v16 = vadd.f32 %v220_v4, %v219_v30  ;;  %v228_v19 = vsel %vm59_vm0, %v826_v1, 0.0  ;;  %v389_v33 = vrot.slane %v388_v3, 4  ;;  %v381_v27 = vadd.f32 %v380_v26, %v379_v61 }
  0x2f   :  { %v836_v13 = vpop.eup %585  ;;  %v83_v14 = vrot.slane %v82_v2, 1  ;;  %v229_v21 = vsel %vm61_vm1, %v832_v5, 0.0  ;;  %v457_v58 = vrot.slane %v456_v40, 4  ;;  %v373_v53 = vrot.slane %v372_v41, 2 }
  0x30   :  { %v842_v22 = vpop.eup %587  ;;  %v230_v35 = vadd.f32 %v229_v21, %v228_v19  ;;  %v222_v23 = vrot.slane %v221_v16, 4  ;;  %v237_v39 = vsel %vm59_vm0, %v836_v13, 0.0  ;;  %v390_v49 = vadd.f32 %v389_v33, %v388_v3 }
  0x31   :  { %v84_v32 = vadd.f32 %v83_v14, %v82_v2  ;;  %v844_v38 = vpop.eup %589  ;;  %v238_v43 = vsel %vm61_vm1, %v842_v22, 0.0  ;;  %v382_v30 = vrot.slane %v381_v27, 2  ;;  %v432_v61 = vrot.slane %v431_v46, 2 }
  0x32   :  { %v848_v24 = vpop.eup %591  ;;  %v231_v25 = vrot.slane %v230_v35, 4  ;;  %v239_v50 = vadd.f32 %v238_v43, %v237_v39  ;;  %v246_v51 = vsel %vm59_vm0, %v844_v38, 0.0  ;;  %v223_v55 = vadd.f32 %v222_v23, %v221_v16 }
  0x33   :  { %593 = vlog2.f32 %v84_v32  ;;  %v247_v57 = vsel %vm61_vm1, %v848_v24, 0.0  ;;  %v449_v59 = vadd.f32 %v448_v48, %v447_v31  ;;  %v391_v4 = vrot.slane %v390_v49, 2 }
  0x34   :  { %v232_v63 = vadd.f32 %v231_v25, %v230_v35  ;;  %v240_v0 = vrot.slane %v239_v50, 4  ;;  %v248_v2 = vadd.f32 %v247_v57, %v246_v51  ;;  %v441_v8 = vrot.slane %v440_v29, 2 }
  0x35   :  { %v365_v9 = vadd.f32 %v364_v54, %v363_v17  ;;  %v224_v10 = vrot.slane %v223_v55, 2  ;;  %v458_v62 = vadd.f32 %v457_v58, %v456_v40  ;;  %v374_v14 = vadd.f32 %v373_v53, %v372_v41 }
  0x36   :  { %v241_v3 = vadd.f32 %v240_v0, %v239_v50  ;;  %v249_v6 = vrot.slane %v248_v2, 4  ;;  %v233_v16 = vrot.slane %v232_v63, 2  ;;  %v383_v19 = vadd.f32 %v382_v30, %v381_v27 }
  0x37   :  { %v450_v11 = vrot.slane %v449_v59, 2  ;;  %v392_v32 = vadd.f32 %v391_v4, %v390_v49  ;;  %v433_v33 = vadd.f32 %v432_v61, %v431_v46  ;;  %v442_v35 = vadd.f32 %v441_v8, %v440_v29 }
  0x38   :  { %v242_v21 = vrot.slane %v241_v3, 2  ;;  %v250_v26 = vadd.f32 %v249_v6, %v248_v2  ;;  %v366_v36 = vrot.slane %v365_v9, 1  ;;  %v225_v23 = vadd.f32 %v224_v10, %v223_v55 }
  0x39   :  { %v459_v39 = vrot.slane %v458_v62, 2  ;;  %v375_v31 = vrot.slane %v374_v14, 1  ;;  %v234_v25 = vadd.f32 %v233_v16, %v232_v63  ;;  %v384_v48 = vrot.slane %v383_v19, 1 }
  0x3a   :  { %v243_v50 = vadd.f32 %v242_v21, %v241_v3  ;;  %v251_v17 = vrot.slane %v250_v26, 2  ;;  %v451_v51 = vadd.f32 %v450_v11, %v449_v59  ;;  %v393_v41 = vrot.slane %v392_v32, 1 }
  0x3b   :  { %v434_v54 = vrot.slane %v433_v33, 1  ;;  %v443_v27 = vrot.slane %v442_v35, 1  ;;  %v367_v57 = vadd.f32 %v366_v36, %v365_v9  ;;  %v226_v58 = vrot.slane %v225_v23, 1 }
  0x3c   :  { %v460_v53 = vadd.f32 %v459_v39, %v458_v62  ;;  %v376_v29 = vadd.f32 %v375_v31, %v374_v14  ;;  %v235_v55 = vrot.slane %v234_v25, 1  ;;  %v385_v0 = vadd.f32 %v384_v48, %v383_v19 }
  0x3d   :  { %v244_v63 = vrot.slane %v243_v50, 1  ;;  %v252_v2 = vadd.f32 %v251_v17, %v250_v26  ;;  %v452_v30 = vrot.slane %v451_v51, 1  ;;  %v394_v61 = vadd.f32 %v393_v41, %v392_v32 }
  0x3e   :  { %v435_v59 = vadd.f32 %v434_v54, %v433_v33  ;;  %v444_v4 = vadd.f32 %v443_v27, %v442_v35  ;;  %595 = vrcp.f32 %v367_v57  ;;  %v227_v3 = vadd.f32 %v226_v58, %v225_v23 }
  0x3f   :  { %597 = vrcp.f32 %v376_v29  ;;  %v461_v6 = vrot.slane %v460_v53, 1  ;;  %v253_v8 = vrot.slane %v252_v2, 1  ;;  %v453_v9 = vadd.f32 %v452_v30, %v451_v51 }
  0x40   :  { %v594_v43 = vpop.eup %593  ;;  %599 = vrcp.f32 %v385_v0  ;;  %v467_v10 = vsel %vm271_vm5, %v444_v4, %v435_v59 }
  0x41   :  { %v86_v40 = vmul.f32 0.6931472, %v594_v43  ;;  %601 = vrcp.f32 %v394_v61  ;;  %v861_v19 = vadd.f32 %v253_v8, %v252_v2  ;;  %v863_v21 = vadd.f32 %v461_v6, %v460_v53 }
  0x42   :  { %603 = vrcp.f32 %v227_v3  ;;  %v866_v26 = vsel %vm273_vm6, %v453_v9, %v467_v10 }
  0x43   :  { %v87_v46 = vsub.f32 %v750_v44, %v86_v40  ;;  %v88_v49 = vsub.f32 %v752_v45, %v86_v40  ;;  %v236_v44 = vadd.f32 %v235_v55, %v234_v25  ;;  %v245_v45 = vadd.f32 %v244_v63, %v243_v50 }
  0x45   :  { %89 = vst.msk [vmem:[#allocation2] sm:$0xff] %vm59_vm0, %v87_v46  ;;  %605 = vrcp.f32 %v236_v44 }
  0x46   :  { %90 = vst.msk [vmem:[#allocation2 + $0x8] sm:$0x3] %vm61_vm1, %v88_v49  ;;  %607 = vrcp.f32 %v245_v45 }
  0x47   :  { %609 = vrcp.f32 %v861_v19 }
  0x4c   :  { %v107_v62 = vld [vmem:[#allocation2] sm:$0xff] }
  0x4d   :  { %v108_v14 = vld [vmem:[#allocation2 + $0x8] sm:$0x3]  ;;  %v109_v11 = vmul.f32 %v702_v12, %v107_v62  ;;  %v315_v33 = vmul.f32 %v766_v15, %v107_v62  ;;  %v317_v36 = vmul.f32 %v778_v34, %v107_v62  ;;  %v319_v39 = vmul.f32 %v790_v20, %v107_v62 }
  0x4e   :  { %v129_v16 = vld [vmem:[#allocation2 + $0x8] sm:$0x3]  ;;  %v110_v32 = vmul.f32 %v718_v18, %v108_v14  ;;  %v321_v12 = vmul.f32 %v805_v47, %v107_v62  ;;  %v173_v27 = vmul.f32 %v818_v56, %v107_v62  ;;  %v175_v63 = vmul.f32 %v826_v1, %v107_v62 }
  0x4f   :  { %v316_v35 = vmul.f32 %v769_v28, %v129_v16  ;;  %v318_v23 = vmul.f32 %v782_v37, %v129_v16  ;;  %v320_v31 = vmul.f32 %v798_v42, %v129_v16  ;;  %v111_v25 = vsel %vm59_vm0, %v109_v11, 0.0 }
  0x50   :  { %v112_v43 = vsel %vm61_vm1, %v110_v32, 0.0  ;;  %v322_v18 = vmul.f32 %v812_v52, %v129_v16  ;;  %v323_v15 = vsel %vm59_vm0, %v315_v33, 0.0  ;;  %v332_v34 = vsel %vm59_vm0, %v317_v36, 0.0  ;;  %v887_v52 = vpop.eup %595 }
  0x51   :  { %v113_v48 = vadd.f32 %v112_v43, %v111_v25  ;;  %v324_v28 = vsel %vm61_vm1, %v316_v35, 0.0  ;;  %v333_v20 = vsel %vm61_vm1, %v318_v23, 0.0  ;;  %v341_v42 = vsel %vm59_vm0, %v319_v39, 0.0  ;;  %v892_v58 = vpop.eup %597 }
  0x52   :  { %v325_v37 = vadd.f32 %v324_v28, %v323_v15  ;;  %v342_v50 = vsel %vm61_vm1, %v320_v31, 0.0  ;;  %v334_v51 = vadd.f32 %v333_v20, %v332_v34  ;;  %v350_v47 = vsel %vm59_vm0, %v321_v12, 0.0  ;;  %v600_v55 = vpop.eup %599 }
  0x53   :  { %v114_v17 = vrot.slane %v113_v48, 4  ;;  %v343_v40 = vadd.f32 %v342_v50, %v341_v42  ;;  %v351_v54 = vsel %vm61_vm1, %v322_v18, 0.0  ;;  %v174_v57 = vmul.f32 %v822_v60, %v129_v16  ;;  %v897_v61 = vpop.eup %601 }
  0x54   :  { %v326_v41 = vrot.slane %v325_v37, 4  ;;  %v335_v46 = vrot.slane %v334_v51, 4  ;;  %v352_v29 = vadd.f32 %v351_v54, %v350_v47  ;;  %v176_v2 = vmul.f32 %v832_v5, %v129_v16  ;;  %v899_v3 = vpop.eup %603 }
  0x55   :  { %v115_v53 = vadd.f32 %v114_v17, %v113_v48  ;;  %v344_v49 = vrot.slane %v343_v40, 4  ;;  %v177_v30 = vmul.f32 %v836_v13, %v107_v62  ;;  %v178_v6 = vmul.f32 %v842_v22, %v129_v16  ;;  %v904_v1 = vpop.eup %605 }
  0x56   :  { %v327_v0 = vadd.f32 %v326_v41, %v325_v37  ;;  %v336_v56 = vadd.f32 %v335_v46, %v334_v51  ;;  %v353_v60 = vrot.slane %v352_v29, 4  ;;  %v179_v45 = vmul.f32 %v844_v38, %v107_v62  ;;  %v906_v14 = vpop.eup %607 }
  0x57   :  { %v116_v59 = vrot.slane %v115_v53, 2  ;;  %v345_v4 = vadd.f32 %v344_v49, %v343_v40  ;;  %v180_v8 = vmul.f32 %v848_v24, %v129_v16  ;;  %v182_v32 = vsel %vm59_vm0, %v173_v27, 0.0 }
  0x58   :  { %v328_v44 = vrot.slane %v327_v0, 2  ;;  %v337_v9 = vrot.slane %v336_v56, 2  ;;  %v354_v10 = vadd.f32 %v353_v60, %v352_v29  ;;  %v184_v33 = vsel %vm61_vm1, %v174_v57, 0.0 }
  0x59   :  { %v117_v5 = vadd.f32 %v116_v59, %v115_v53  ;;  %v346_v13 = vrot.slane %v345_v4, 2  ;;  %v192_v35 = vsel %vm59_vm0, %v175_v63, 0.0  ;;  %v185_v16 = vadd.f32 %v184_v33, %v182_v32 }
  0x5a   :  { %v329_v11 = vadd.f32 %v328_v44, %v327_v0  ;;  %v338_v36 = vadd.f32 %v337_v9, %v336_v56  ;;  %v355_v62 = vrot.slane %v354_v10, 2  ;;  %v193_v23 = vsel %vm61_vm1, %v176_v2, 0.0 }
  0x5b   :  { %v118_v22 = vrot.slane %v117_v5, 1  ;;  %v347_v38 = vadd.f32 %v346_v13, %v345_v4  ;;  %v201_v39 = vsel %vm59_vm0, %v177_v30, 0.0  ;;  %v186_v48 = vrot.slane %v185_v16, 4 }
  0x5c   :  { %v330_v24 = vrot.slane %v329_v11, 1  ;;  %v339_v25 = vrot.slane %v338_v36, 1  ;;  %v356_v12 = vadd.f32 %v355_v62, %v354_v10  ;;  %v194_v15 = vadd.f32 %v193_v23, %v192_v35 }
  0x5d   :  { %v119_v31 = vadd.f32 %v118_v22, %v117_v5  ;;  %v348_v43 = vrot.slane %v347_v38, 1  ;;  %v202_v28 = vsel %vm61_vm1, %v178_v6, 0.0  ;;  %v187_v17 = vadd.f32 %v186_v48, %v185_v16 }
  0x5e   :  { %v331_v18 = vadd.f32 %v330_v24, %v329_v11  ;;  %v340_v37 = vadd.f32 %v339_v25, %v338_v36  ;;  %v357_v42 = vrot.slane %v356_v12, 1  ;;  %v195_v51 = vrot.slane %v194_v15, 4 }
  0x5f   :  { %v120_v34 = vsub.f32 0.0, %v119_v31  ;;  %v349_v20 = vadd.f32 %v348_v43, %v347_v38  ;;  %v203_v40 = vadd.f32 %v202_v28, %v201_v39  ;;  %v188_v53 = vrot.slane %v187_v17, 2  ;;  %v610_v43 = vpop.eup %609 }
  0x60   :  { %v395_v50 = vsub.f32 0.0, %v331_v18  ;;  %v358_v41 = vadd.f32 %v357_v42, %v356_v12  ;;  %v396_v54 = vsub.f32 0.0, %v340_v37  ;;  %v196_v46 = vadd.f32 %v195_v51, %v194_v15 }
  0x61   :  { %v121_v47 = vsel %vm59_vm0, %v120_v34, 0.0  ;;  %v397_v27 = vsub.f32 0.0, %v349_v20  ;;  %v204_v49 = vrot.slane %v203_v40, 4  ;;  %v210_v2 = vsel %vm59_vm0, %v179_v45, 0.0 }
  0x62   :  { %122 = vadd.xlane.f32.xlu0 %v121_v47  ;;  %v403_v57 = vmul.f32 %v887_v52, %v395_v50  ;;  %v398_v29 = vsub.f32 0.0, %v358_v41  ;;  %v404_v0 = vmul.f32 %v892_v58, %v396_v54  ;;  %v189_v30 = vadd.f32 %v188_v53, %v187_v17 }
  0x63   :  { %v405_v63 = vmul.f32 %v600_v55, %v397_v27  ;;  %v197_v59 = vrot.slane %v196_v46, 2  ;;  %v205_v56 = vadd.f32 %v204_v49, %v203_v40  ;;  %v211_v4 = vsel %vm61_vm1, %v180_v8, 0.0 }
  0x64   :  { %v406_v60 = vmul.f32 %v897_v61, %v398_v29  ;;  %v411_v44 = vsel %vm271_vm5, %v404_v0, %v403_v57  ;;  %v212_v6 = vadd.f32 %v211_v4, %v210_v2  ;;  %v190_v5 = vrot.slane %v189_v30, 1 }
  0x65   :  { %v412_v52 = vsel %vm273_vm6, %v405_v63, %v411_v44  ;;  %v198_v9 = vadd.f32 %v197_v59, %v196_v46  ;;  %v206_v58 = vrot.slane %v205_v56, 2  ;;  %v469_v13 = vsel %vm275_vm7, %v863_v21, %v866_v26 }
  0x66   :  { %v413_v55 = vsel %vm275_vm7, %v406_v60, %v412_v52  ;;  %v213_v45 = vrot.slane %v212_v6, 4  ;;  %v191_v61 = vadd.f32 %v190_v5, %v189_v30  ;;  %v471_v22 = vsel %vm278_vm8, %v469_v13, 0.0 }
  0x67   :  { %v415_v8 = vsel %vm278_vm8, %v413_v55, 0.0  ;;  %v199_v10 = vrot.slane %v198_v9, 1  ;;  %v207_v11 = vadd.f32 %v206_v58, %v205_v56 }
  0x68   :  { %416 = vadd.xlane.f32.xlu1 %v415_v8  ;;  %v214_v32 = vadd.f32 %v213_v45, %v212_v6  ;;  %v255_v35 = vsub.f32 0.0, %v191_v61 }
  0x69   :  { %v200_v19 = vadd.f32 %v199_v10, %v198_v9  ;;  %v208_v33 = vrot.slane %v207_v11, 1 }
  0x6a   :  { %v215_v36 = vrot.slane %v214_v32, 2  ;;  %v263_v16 = vmul.f32 %v899_v3, %v255_v35 }
  0x6b   :  { %v209_v38 = vadd.f32 %v208_v33, %v207_v11  ;;  %v256_v62 = vsub.f32 0.0, %v200_v19 }
  0x6c   :  { %v216_v24 = vadd.f32 %v215_v36, %v214_v32  ;;  %472 = vadd.xlane.f32.xlu1 %v471_v22 }
  0x6d   :  { %v257_v21 = vsub.f32 0.0, %v209_v38  ;;  %v264_v26 = vmul.f32 %v904_v1, %v256_v62 }
  0x6e   :  { %v217_v23 = vrot.slane %v216_v24, 1 }
  0x6f   :  { %v265_v39 = vmul.f32 %v906_v14, %v257_v21  ;;  %v272_v25 = vsel %vm271_vm5, %v264_v26, %v263_v16 }
  0x70   :  { %v218_v31 = vadd.f32 %v217_v23, %v216_v24 }
  0x71   :  { %v274_v18 = vsel %vm273_vm6, %v265_v39, %v272_v25 }
  0x72   :  { %v258_v12 = vsub.f32 0.0, %v218_v31 }
  0x74   :  { %v266_v48 = vmul.f32 %v610_v43, %v258_v12 }
  0x76   :  { %v276_v15 = vsel %vm275_vm7, %v266_v48, %v274_v18 }
  0x77   :  { %v279_v28 = vsel %vm278_vm8, %v276_v15, 0.0 }
  0x78   :  { %280 = vadd.xlane.f32.xlu0 %v279_v28 }
  0xeb   :  { %v123_v3 = vpop.xlane.xlu0 %122 }
  0xec   :  { %v124_v34 = vmul.f32 0.125, %v123_v3 }
  0xee   :  { %126 = vst.msk [vmem:[#allocation4] sm:$0x1] %vm125_vm4, %v124_v34 }
  0xf5   :  { %v515_v1 = vld [vmem:[#allocation4] sm:$0x1] }
  0xf6   :  { %516 = vst.msk [vmem:[#allocation8] sm:$0x1] %vm125_vm4, %v515_v1 }
  0xf7   :  { %622 = shalt.err (!%p619_p4)
}
  0xf8   :  { %536 = dma.vmem_to_hbm [thread:$0]  %s534_s5, 16, %s951_s4, [#allocation9]   ;;  %v132_v14 = vld [vmem:[#allocation4] sm:$0x1]  ;;  %v417_v37 = vpop.xlane.xlu1 %416  ;;  %v477_v42 = vsub.s32 0, %v694_v7  ;;  %vm499_vm9 = vcmask 3072  }
  0xf9   :  { %v484_v20 = vmul.f32 0.5, %v132_v14  ;;  %v418_v50 = vmul.f32 0.125, %v417_v37  ;;  %v498_v6 = vld [vmem:[#allocation5] sm:$0x1]  ;;  %s657_s4 = smov [#allocation6]  }
  0xfa   :  { %v478_v40 = vrot.slane %v132_v14, %v477_v42  ;;  %s523_s10 = sshll.u32 %s657_s4, 4  ;;  %s524_s10 = int_to_ptr.vmem [resolvable:$true] %s523_s10 }
  0xfb   :  { %v489_v17 = vrot.slane %v484_v20, %v477_v42  ;;  %s631_s11 = scalar_lea.vmem %s524_s10, 16  ;;  %s635_s12 = scalar_lea.vmem %s524_s10, 32 }
  0xfc   :  { %v473_v51 = vpop.xlane.xlu1 %472  ;;  %p632_p5 = scmp.ne.s32.totalorder %s524_s10, %s631_s11  ;;  %p636_p6 = scmp.lt.s32.totalorder %s524_s10, %s524_s10 }
  0xfd   :  { %v491_v41 = vsub.f32 %v418_v50, %v489_v17  ;;  %v481_v27 = vmul.f32 0.05, %v473_v51  ;;  %v494_v46 = vmul.f32 0.0125, %v473_v51  ;;  %p637_p7 = scmp.lt.s32.totalorder %s635_s12, %s631_s11 }
  0xff   :  { %p638_p8 = por %p637_p7, %p636_p6 }
 0x101   :  { %v281_v47 = vpop.xlane.xlu0 %280  ;;  %p639_p9 = pnand %p638_p8, %p632_p5 }
 0x102   :  { %v282_v54 = vmul.f32 0.125, %v281_v47 }
 0x104   :  { %v480_v57 = vsub.f32 %v478_v40, %v282_v54  ;;  %v492_v53 = vmul.f32 0.5, %v282_v54 }
 0x106   :  { %v493_v49 = vsub.f32 %v491_v41, %v492_v53  ;;  %v482_v29 = vadd.f32 %v481_v27, %v480_v57 }
 0x108   :  { %v495_v0 = vadd.f32 %v494_v46, %v493_v49  ;;  %v483_v63 = vmax.f32 %v482_v29, 0.0 }
 0x10a   :  { %v496_v2 = vmax.f32 %v495_v0, 0.0 }
 0x10c   :  { %v497_v30 = vadd.f32 %v496_v2, %v483_v63 }
 0x10e   :  { %v500_v59 = vsel %vm499_vm9, %v497_v30, 0.0 }
 0x10f   :  { %v501_v7 = vrot.slane %v500_v59, 4 }
 0x111   :  { %v502_v56 = vadd.f32 %v501_v7, %v500_v59 }
 0x113   :  { %v503_v4 = vrot.slane %v502_v56, 2 }
 0x115   :  { %v504_v60 = vadd.f32 %v503_v4, %v502_v56 }
 0x117   :  { %v505_v44 = vrot.slane %v504_v60, 1 }
 0x119   :  { %v506_v52 = vadd.f32 %v505_v44, %v504_v60 }
 0x11b   :  { %v507_v5 = vadd.f32 %v506_v52, %v498_v6 }
 0x11d   :  { %509 = vst.msk [vmem:[#allocation5] sm:$0x1] %vm125_vm4, %v507_v5 }
 0x124   :  { %v513_v9 = vld [vmem:[#allocation5] sm:$0x1] }
 0x125   :  { %514 = vst.msk [vmem:[#allocation6] sm:$0x1] %vm125_vm4, %v513_v9 }
 0x126   :  { %642 = shalt.err (!%p639_p9)
}
 0x127   :  { %526 = dma.vmem_to_hbm [thread:$0]  %s524_s10, 16, %s950_s3, [#allocation7]  }
 0x128   :  { %651 = dma.done.wait [#allocation7], 16  }
 0x129   :  { %652 = vsyncadd [#allocation7], 4294967280 }
 0x12a   :  { %653 = dma.done.wait [#allocation9], 16  }
 0x12b   :  { %654 = vsyncadd [#allocation9], 4294967280 }
 0x12c   :  { %543 = vsyncpa [#allocation7], 1 }
 0x12d   :  { %544 = vsyncpa [#allocation9], 1 }

</bundles_post_ra>
